<compile_context>
chip_gen: v6e
topology: v6e:2x2x1
jax: 0.10.0
libtpu: 0.0.40
codegen_flags: <defaults>
</compile_context>

<pallas_src>
import functools

import jax
import jax.numpy as jnp
from jax import lax
from jax.experimental import pallas as pl
from jax.experimental.pallas import tpu as pltpu

_LANES = 128
_MAX_TILE_ROWS = 8192                       # 8192*128*4B = 4 MiB per f32 block
_DB_INPUT_VMEM_BUDGET = 16 * 1024 * 1024    # double-buffered input bytes
_VMEM_LIMIT_BYTES = 32 * 1024 * 1024        # explicit scoped-VMEM limit
_N_CORE_SPLITS = 2                          # v7x has 2 TCs; harmless elsewhere


def _cdiv(a, b):
    return -(-a // b)


def _round_up(x, m):
    return _cdiv(x, m) * m


def _sigmoid(x):
    # one EUP op (tanh) instead of exp + reciprocal
    return 0.5 * (jnp.tanh(0.5 * x) + 1.0)


def _tail_mask(shape, step, tr, rows, rem_lanes):
    """Validity mask for a ragged boundary block (shapes static, step traced)."""
    row = lax.broadcasted_iota(jnp.int32, shape, 0) + step * tr
    if rem_lanes == 0:
        return row < rows
    lane = lax.broadcasted_iota(jnp.int32, shape, 1)
    return (row < rows - 1) | ((row == rows - 1) & (lane < rem_lanes))


# --------------------------------------------------------------------------
# Kernels
# --------------------------------------------------------------------------
def _dice_sums_kernel(p_ref, g_ref, out_ref, *, logit, tr, nblocks, npc,
                      rows, rem_lanes):
    """Per-core resident (16,128) accumulator:
       rows 0..7  += partial sums of p*g
       rows 8..15 += partial sums of p+g   (only their sum is ever needed)."""
    c = pl.program_id(0)
    i = pl.program_id(1)

    @pl.when(i == 0)
    def _init():
        out_ref[...] = jnp.zeros_like(out_ref)

    step = c * npc + i

    def _accum():
        p = p_ref[...].astype(jnp.float32)
        g = g_ref[...].astype(jnp.float32)
        if logit:
            p = _sigmoid(p)
        pg = p * g
        ps = p + g
        if (rows % tr != 0) or (rem_lanes != 0):       # static: ragged tail exists
            valid = _tail_mask(pg.shape, step, tr, rows, rem_lanes)
            pg = jnp.where(valid, pg, 0.0)
            ps = jnp.where(valid, ps, 0.0)
        if tr % 8 == 0:
            out_ref[0:8, :] += pg.reshape(tr // 8, 8, _LANES).sum(axis=0)
            out_ref[8:16, :] += ps.reshape(tr // 8, 8, _LANES).sum(axis=0)
        else:                                          # tiny single-block case
            out_ref[0:1, :] += jnp.sum(pg, axis=0, keepdims=True)
            out_ref[8:9, :] += jnp.sum(ps, axis=0, keepdims=True)

    if nblocks == npc * _N_CORE_SPLITS:                # static: no duplicate step
        _accum()
    else:
        pl.when(step < nblocks)(_accum)


def _var_sums_kernel(x_ref, out_ref, *, logit, inv_v, tr, nblocks, npc,
                     rows, rem_lanes):
    """Per-core resident (8,128) accumulator of sum over views of (x-mean)^2."""
    c = pl.program_id(0)
    i = pl.program_id(1)

    @pl.when(i == 0)
    def _init():
        out_ref[...] = jnp.zeros_like(out_ref)

    step = c * npc + i

    def _accum():
        x = x_ref[...].astype(jnp.float32)             # (V, tr, 128)
        if logit:
            x = _sigmoid(x)
        m = jnp.sum(x, axis=0, keepdims=True) * inv_v  # cross-view mean
        d = x - m
        per_pix = jnp.sum(d * d, axis=0)               # (tr, 128)
        if (rows % tr != 0) or (rem_lanes != 0):
            valid = _tail_mask(per_pix.shape, step, tr, rows, rem_lanes)
            per_pix = jnp.where(valid, per_pix, 0.0)
        if tr % 8 == 0:
            out_ref[0:8, :] += per_pix.reshape(tr // 8, 8, _LANES).sum(axis=0)
        else:
            out_ref[0:1, :] += jnp.sum(per_pix, axis=0, keepdims=True)

    if nblocks == npc * _N_CORE_SPLITS:
        _accum()
    else:
        pl.when(step < nblocks)(_accum)


# --------------------------------------------------------------------------
# Wrapper helpers
# --------------------------------------------------------------------------
def _flat_to_lane_major(x):
    """Free reshape to lane-dense (rows,128); only a sub-128 remainder is padded
    (value irrelevant -> masked in-kernel)."""
    flat = x.reshape(-1)
    n = flat.shape[0]
    rem = n % _LANES
    rows = _cdiv(n, _LANES)
    if rem:
        flat = jnp.pad(flat, (0, _LANES - rem))
    return flat.reshape(rows, _LANES), n, rows, rem


def _views_to_lane_major(x, v):
    flat = x.reshape(v, -1)
    n = flat.shape[1]
    rem = n % _LANES
    rows = _cdiv(n, _LANES)
    if rem:
        flat = jnp.pad(flat, ((0, 0), (0, _LANES - rem)))
    return flat.reshape(v, rows, _LANES), n, rows, rem


def _choose_tile_rows(rows, input_bytes_per_row):
    """Largest row tile s.t. the double-buffered input working set fits the VMEM
    budget, a multiple of 8, and small enough that both cores get work."""
    cap = _DB_INPUT_VMEM_BUDGET // max(2 * input_bytes_per_row, 1)
    cap = max(8, min(_MAX_TILE_ROWS, (cap // 8) * 8))
    tr = min(cap, _round_up(_cdiv(rows, _N_CORE_SPLITS), 8))
    if tr >= rows:
        tr = rows                # single block per core; full-dim escape hatch
    return tr


def _grid_for(rows, tr):
    nblocks = _cdiv(rows, tr)
    npc = _cdiv(nblocks, _N_CORE_SPLITS)
    return (_N_CORE_SPLITS, npc), nblocks, npc


# --------------------------------------------------------------------------
# Public losses
# --------------------------------------------------------------------------
def dice_loss_pallas(pred, gt, *, logit=True, smooth=0.1):
    """DiceLoss(logit, smooth).forward(pred, gt)."""
    p2, _, rows, rem = _flat_to_lane_major(pred)
    g2, _, _, _ = _flat_to_lane_major(gt)

    bytes_per_row = _LANES * (p2.dtype.itemsize + g2.dtype.itemsize)
    tr = _choose_tile_rows(rows, bytes_per_row)
    grid, nblocks, npc = _grid_for(rows, tr)

    def _in_map(c, i):
        return (jnp.minimum(c * npc + i, nblocks - 1), 0)

    out = pl.pallas_call(
        functools.partial(_dice_sums_kernel, logit=logit, tr=tr,
                          nblocks=nblocks, npc=npc, rows=rows, rem_lanes=rem),
        out_shape=jax.ShapeDtypeStruct((_N_CORE_SPLITS * 16, _LANES), jnp.float32),
        grid_spec=pltpu.PrefetchScalarGridSpec(
            num_scalar_prefetch=0,
            grid=grid,
            in_specs=[pl.BlockSpec((tr, _LANES), _in_map),
                      pl.BlockSpec((tr, _LANES), _in_map)],
            out_specs=pl.BlockSpec((16, _LANES), lambda c, i: (c, 0)),
        ),
        compiler_params=pltpu.CompilerParams(
            dimension_semantics=("parallel", "arbitrary"),
            vmem_limit_bytes=_VMEM_LIMIT_BYTES),
    )(p2, g2)

    o = out.reshape(_N_CORE_SPLITS, 16, _LANES)
    s_pg = jnp.sum(o[:, 0:8, :])     # single cross-lane reduce done by XLA
    s_den = jnp.sum(o[:, 8:16, :])
    return 1.0 - (2.0 * s_pg + smooth) / (s_den + smooth)


def variance_loss_pallas(inputs, *, logit=True):
    """VarianceLoss(logit).forward(inputs=inputs); dim 0 = views."""
    v = int(inputs.shape[0])
    x3, n, rows, rem = _views_to_lane_major(inputs, v)

    bytes_per_row = v * _LANES * x3.dtype.itemsize
    tr = _choose_tile_rows(rows, bytes_per_row)
    grid, nblocks, npc = _grid_for(rows, tr)

    def _in_map(c, i):
        return (0, jnp.minimum(c * npc + i, nblocks - 1), 0)

    out = pl.pallas_call(
        functools.partial(_var_sums_kernel, logit=logit, inv_v=1.0 / v, tr=tr,
                          nblocks=nblocks, npc=npc, rows=rows, rem_lanes=rem),
        out_shape=jax.ShapeDtypeStruct((_N_CORE_SPLITS * 8, _LANES), jnp.float32),
        grid_spec=pltpu.PrefetchScalarGridSpec(
            num_scalar_prefetch=0,
            grid=grid,
            in_specs=[pl.BlockSpec((v, tr, _LANES), _in_map)],
            out_specs=pl.BlockSpec((8, _LANES), lambda c, i: (c, 0)),
        ),
        compiler_params=pltpu.CompilerParams(
            dimension_semantics=("parallel", "arbitrary"),
            vmem_limit_bytes=_VMEM_LIMIT_BYTES),
    )(x3)

    return jnp.sum(out) / (v * n)


def dice_consist_var_loss(**kwargs):
    """JAX/Pallas equivalent of Dice_ConsistVarLoss(logit=True).forward(**kwargs)."""
    pred_labeled = kwargs["pred_labeled"]
    gt_labeled = kwargs["gt_labeled"]
    pred_unlabeled = kwargs.get("pred_unlabeled", None)
    weight = kwargs.get("weight", 0.0)
    logit = kwargs.get("logit", True)

    loss_dice_labeled = dice_loss_pallas(pred_labeled, gt_labeled, logit=logit)
    loss_var_labeled = 0.0
    loss_var_unlabeled = 0.0
    if pred_unlabeled is not None:
        loss_var_unlabeled = variance_loss_pallas(pred_unlabeled, logit=logit)

    total = loss_dice_labeled + loss_var_labeled + weight * loss_var_unlabeled
    return total, loss_dice_labeled, loss_var_labeled, loss_var_unlabeled


# --------------------------------------------------------------------------
# Pure-JAX reference (mirrors the PyTorch forward) and self-test
# --------------------------------------------------------------------------
def _reference(pred_labeled, gt_labeled, pred_unlabeled, weight,
               logit=True, smooth=0.1):
    p = jax.nn.sigmoid(pred_labeled) if logit else pred_labeled
    dice = (2.0 * jnp.sum(p * gt_labeled) + smooth) / \
           (jnp.sum(p) + jnp.sum(gt_labeled) + smooth)
    loss_dice = 1.0 - dice
    loss_var = 0.0
    if pred_unlabeled is not None:
        x = jax.nn.sigmoid(pred_unlabeled) if logit else pred_unlabeled
        m = jnp.mean(x, axis=0, keepdims=True)
        loss_var = jnp.mean((x - m) ** 2)
    return loss_dice + weight * loss_var, loss_dice, 0.0, loss_var


if __name__ == "__main__":
    key = jax.random.PRNGKey(0)
    k1, k2, k3 = jax.random.split(key, 3)

    B, C, H, W = 2, 4, 16, 16      # labeled batch
    V = 2                          # views for the unlabeled consistency term

    pred_labeled = jax.random.normal(k1, (B, C, H, W), jnp.float32)       # logits
    gt_labeled = (jax.random.uniform(k2, (B, C, H, W)) < 0.5).astype(jnp.float32)
    pred_unlabeled = jax.random.normal(k3, (V, B, C, H, W), jnp.float32)  # logits
    weight = 0.3

    total, l_dice, l_var_l, l_var_u = dice_consist_var_loss(
        pred_labeled=pred_labeled, gt_labeled=gt_labeled,
        pred_unlabeled=pred_unlabeled, weight=weight)
    total = jax.block_until_ready(total)

    r_total, r_dice, _, r_var = _reference(pred_labeled, gt_labeled,
                                           pred_unlabeled, weight)
    assert abs(float(total) - float(r_total)) < 1e-4, (float(total), float(r_total))
    assert abs(float(l_dice) - float(r_dice)) < 1e-4, (float(l_dice), float(r_dice))
    assert abs(float(l_var_u) - float(r_var)) < 1e-4, (float(l_var_u), float(r_var))

    # ragged path: element count not a multiple of 128 (lane-tail + tiny tiles)
    k4, k5, k6 = jax.random.split(jax.random.PRNGKey(1), 3)
    p_odd = jax.random.normal(k4, (1, 3, 7, 9), jnp.float32)
    g_odd = (jax.random.uniform(k5, (1, 3, 7, 9)) < 0.5).astype(jnp.float32)
    u_odd = jax.random.normal(k6, (3, 1, 3, 7, 9), jnp.float32)
    t2, d2, _, v2 = dice_consist_var_loss(pred_labeled=p_odd, gt_labeled=g_odd,
                                          pred_unlabeled=u_odd, weight=0.5)
    t2 = jax.block_until_ready(t2)
    rt2, rd2, _, rv2 = _reference(p_odd, g_odd, u_odd, 0.5)
    assert abs(float(t2) - float(rt2)) < 1e-4, (float(t2), float(rt2))
    assert abs(float(d2) - float(rd2)) < 1e-4, (float(d2), float(rd2))
    assert abs(float(v2) - float(rv2)) < 1e-4, (float(v2), float(rv2))

    # also exercise the pred_unlabeled=None path
    t3, d3, _, v3 = dice_consist_var_loss(pred_labeled=pred_labeled,
                                          gt_labeled=gt_labeled)
    t3 = jax.block_until_ready(t3)
    assert abs(float(t3) - float(d3)) < 1e-6 and float(v3) == 0.0

    print("KERNEL_OK")
</pallas_src>

<mosaic_0001>
module attributes {stable_mosaic.version = 11 : i64} {
  func.func @_dice_sums_kernel(%arg0: i32, %arg1: i32, %arg2: memref<8x128xf32, #tpu.memory_space<vmem>>, %arg3: memref<8x128xf32, #tpu.memory_space<vmem>>, %arg4: memref<16x128xf32, #tpu.memory_space<vmem>>) attributes {dimension_semantics = [#tpu.dimension_semantics<parallel>, #tpu.dimension_semantics<arbitrary>], iteration_bounds = array<i64: 2, 1>, scalar_prefetch = 0 : i64, scratch_operands = 0 : i64, tpu.core_type = #tpu.core_type<tc>, window_params = [{transform_indices = @transform_0, window_bounds = array<i64: 8, 128>}, {transform_indices = @transform_1, window_bounds = array<i64: 8, 128>}, {transform_indices = @transform_2, window_bounds = array<i64: 16, 128>}]} {
    %c0_i32 = arith.constant 0 : i32
    %0 = arith.cmpi eq, %arg1, %c0_i32 : i32
    %1 = arith.extui %0 : i1 to i32
    %c0_i32_0 = arith.constant 0 : i32
    %2 = arith.cmpi ne, %1, %c0_i32_0 : i32
    scf.if %2 {
      %cst_15 = arith.constant 0.000000e+00 : f32
      %24 = vector.broadcast %cst_15 : f32 to vector<16x128xf32>
      %c0_16 = arith.constant 0 : index
      %c0_17 = arith.constant 0 : index
      %25 = vector.load %arg4[%c0_16, %c0_17] : memref<16x128xf32, #tpu.memory_space<vmem>>, vector<16x128xf32>
      tpu.vector_store %arg4[%c0_16, %c0_17], %24 {strides = array<i32>} : memref<16x128xf32, #tpu.memory_space<vmem>>, vector<16x128xf32>,
    } else {
    }
    %c0 = arith.constant 0 : index
    %c0_1 = arith.constant 0 : index
    %3 = vector.load %arg2[%c0, %c0_1] : memref<8x128xf32, #tpu.memory_space<vmem>>, vector<8x128xf32>
    %c0_2 = arith.constant 0 : index
    %c0_3 = arith.constant 0 : index
    %4 = vector.load %arg3[%c0_2, %c0_3] : memref<8x128xf32, #tpu.memory_space<vmem>>, vector<8x128xf32>
    %cst = arith.constant 5.000000e-01 : f32
    %5 = vector.broadcast %cst : f32 to vector<8x128xf32>
    %6 = arith.mulf %5, %3 : vector<8x128xf32>
    %7 = math.tanh %6 : vector<8x128xf32>
    %cst_4 = arith.constant 1.000000e+00 : f32
    %8 = vector.broadcast %cst_4 : f32 to vector<8x128xf32>
    %9 = arith.addf %7, %8 : vector<8x128xf32>
    %cst_5 = arith.constant 5.000000e-01 : f32
    %10 = vector.broadcast %cst_5 : f32 to vector<8x128xf32>
    %11 = arith.mulf %10, %9 : vector<8x128xf32>
    %12 = arith.mulf %11, %4 : vector<8x128xf32>
    %13 = arith.addf %11, %4 : vector<8x128xf32>
    %c0_6 = arith.constant 0 : index
    %c0_7 = arith.constant 0 : index
    %14 = vector.load %arg4[%c0_6, %c0_7] : memref<16x128xf32, #tpu.memory_space<vmem>>, vector<8x128xf32>
    %15 = vector.shape_cast %12 : vector<8x128xf32> to vector<1x8x128xf32>
    %cst_8 = arith.constant dense<0.000000e+00> : vector<8x128xf32>
    %16 = vector.multi_reduction <add>, %15, %cst_8 [0] : vector<1x8x128xf32> to vector<8x128xf32>
    %17 = arith.addf %14, %16 : vector<8x128xf32>
    %c0_9 = arith.constant 0 : index
    %c0_10 = arith.constant 0 : index
    %18 = vector.load %arg4[%c0_9, %c0_10] : memref<16x128xf32, #tpu.memory_space<vmem>>, vector<8x128xf32>
    tpu.vector_store %arg4[%c0_9, %c0_10], %17 {strides = array<i32>} : memref<16x128xf32, #tpu.memory_space<vmem>>, vector<8x128xf32>,
    %c8 = arith.constant 8 : index
    %c0_11 = arith.constant 0 : index
    %19 = vector.load %arg4[%c8, %c0_11] : memref<16x128xf32, #tpu.memory_space<vmem>>, vector<8x128xf32>
    %20 = vector.shape_cast %13 : vector<8x128xf32> to vector<1x8x128xf32>
    %cst_12 = arith.constant dense<0.000000e+00> : vector<8x128xf32>
    %21 = vector.multi_reduction <add>, %20, %cst_12 [0] : vector<1x8x128xf32> to vector<8x128xf32>
    %22 = arith.addf %19, %21 : vector<8x128xf32>
    %c8_13 = arith.constant 8 : index
    %c0_14 = arith.constant 0 : index
    %23 = vector.load %arg4[%c8_13, %c0_14] : memref<16x128xf32, #tpu.memory_space<vmem>>, vector<8x128xf32>
    tpu.vector_store %arg4[%c8_13, %c0_14], %22 {strides = array<i32>} : memref<16x128xf32, #tpu.memory_space<vmem>>, vector<8x128xf32>,
    return
  }
  func.func @transform_0(%arg0: i32, %arg1: i32) -> (i32, i32) {
    %c1_i32 = arith.constant 1 : i32
    %0 = arith.muli %arg0, %c1_i32 : i32
    %1 = arith.addi %0, %arg1 : i32
    %c1_i32_0 = arith.constant 1 : i32
    %2 = arith.minsi %1, %c1_i32_0 : i32
    %c0_i32 = arith.constant 0 : i32
    %c0_i32_1 = arith.constant 0 : i32
    return %2, %c0_i32 : i32, i32
  }
  func.func @transform_1(%arg0: i32, %arg1: i32) -> (i32, i32) {
    %c1_i32 = arith.constant 1 : i32
    %0 = arith.muli %arg0, %c1_i32 : i32
    %1 = arith.addi %0, %arg1 : i32
    %c1_i32_0 = arith.constant 1 : i32
    %2 = arith.minsi %1, %c1_i32_0 : i32
    %c0_i32 = arith.constant 0 : i32
    %c0_i32_1 = arith.constant 0 : i32
    return %2, %c0_i32 : i32, i32
  }
  func.func @transform_2(%arg0: i32, %arg1: i32) -> (i32, i32) {
    %c0_i32 = arith.constant 0 : i32
    %c0_i32_0 = arith.constant 0 : i32
    return %arg0, %c0_i32 : i32, i32
  }
}

</mosaic_0001>

<bundles_post_ra>
// kernel: tpu_custom_call.1
= control target key start
LH: loop header
LB: loop body
LE: loop exit
PB: predicated region body
PF: predicated region fallthrough
CT: control target
= control target key end

     0   :  { %s880_s0 = inlined_call_operand.hbm [shape: f32[16,128], index: 0, kind: input, shape index: {}]   ;;  %s881_s1 = inlined_call_operand.hbm [shape: f32[16,128], index: 1, kind: input, shape index: {}]   ;;  %s882_s2 = inlined_call_operand.hbm [shape: f32[32,128], index: 2, kind: output, shape index: {}]  }
   0x1   :  { %883 = sst [smem:[#allocation11_spill]] %s880_s0 }
   0x2   :  { %7 = vsyncpa [#allocation3], 0 }
   0x3   :  { %9 = vsyncpa [#allocation3 + $0x1], 0 }
   0x4   :  { %10 = vsyncpa [#allocation6], 0 }
   0x5   :  { %12 = vsyncpa [#allocation6 + $0x1], 0 }
   0x6   :  { %13 = vsyncpa [#allocation4], 0 }
   0x7   :  { %15 = vsyncpa [#allocation4 + $0x1], 0  ;;  %s673_s9 = smov 0   ;;  %s675_s10 = smov 0  }
   0x8   :  { %s677_s11 = smov 0   ;;  %s679_s12 = smov 0  }
   0x9   :  { %s681_s13 = smov 0   ;;  %s683_s14 = smov 0  }
   0xa   :  { %s685_s15 = smov 0   ;;  %s687_s16 = smov 0  }
   0xb   :  { %s689_s17 = smov 0  }
   0xc LB: > { %s373_s18 = sadd.s32 4294967295, %s651_s17   ;;  %s374_s19 = sadd.s32 4294967294, %s651_s17   ;;  %s651_s17 = sphi %s689_s17, %s21_s17   ;;  %s647_s16 = sphi %s687_s16, %s899_s16   ;;  %s643_s15 = sphi %s685_s15, %s898_s15   ;;  %s639_s14 = sphi %s683_s14, %s897_s14   ;;  %s635_s13 = sphi %s681_s13, %s896_s13   ;;  %s631_s12 = sphi %s679_s12, %s895_s12   ;;  %s627_s11 = sphi %s677_s11, %s894_s11   ;;  %s623_s10 = sphi %s675_s10, %s893_s10   ;;  %s619_s9 = sphi %s673_s9, %s892_s9  }
   0xd   : > { %s33_s20 = sadd.s32 1, %s647_s16  ;;  %p38_p0 = scmp.lt.s32.totalorder %s647_s16, 1 }
   0xe   : > { %p35_p1 = scmp.ge.s32.totalorder %s33_s20, 2  ;;  %s46_s21 = sadd.s32 1, %s639_s14 }
   0xf   : > { %s722_s22 = scalar_select %p38_p0, %s647_s16, 1 }
  0x10   : > { %s901_s20 = smov (%p35_p1, %s33_s20), 0  ;;  %p53_p2 = scmp.ne.s32.totalorder %s639_s14, %s635_s13 }
  0x11   : > { %p54_p3 = scmp.eq.s32.totalorder %s651_s17, 0  ;;  %p41_p4 = scmp.lt.s32.totalorder %s901_s20, 1 }
  0x12   : > { %p59_p5 = scmp.ne.s32.totalorder %s635_s13, %s631_s12  ;;  %p60_p7 = scmp.eq.s32.totalorder %s373_s18, 0 }
  0x13   : > { %p731_p6 = por %p54_p3, %p53_p2  ;;  %s101_s26 = ssub.s32 %s647_s16, %s901_s20 }
  0x14   : > { %s42_s24 = scalar_select %p41_p4, %s901_s20, 1 }
  0x15   : > { %p736_p8 = por %p60_p7, %p59_p5  ;;  %p102_p9 = scmp.eq.s32.totalorder %s101_s26, 0 }
  0x16   : > { %s43_s27 = ssub.s32 %s722_s22, %s42_s24  ;;  %s104_s28 = sadd.s32 1, %s627_s11 }
  0x17   : > { %p44_p10 = scmp.eq.s32.totalorder %s43_s27, 0  ;;  %p114_p11 = scmp.ne.s32.totalorder %s627_s11, %s623_s10 }
  0x18   : > { %s745_s29 = scalar_select %p102_p9, %s627_s11, %s104_s28  }
  0x19   : > { %s748_s30 = scalar_select %p44_p10, %s639_s14, %s46_s21  }
  0x1a   : > { %p115_p12 = scmp.eq.s32.totalorder %s373_s18, 1  ;;  %p120_p13 = scmp.ne.s32.totalorder %s623_s10, %s619_s9 }
  0x1b   : > { %p121_p0 = scmp.eq.s32.totalorder %s374_s19, 1  ;;  %p408_p4 = scmp.lt.s32.totalorder %s651_s17, 2 }
  0x1c   : > { %p754_p1 = por %p115_p12, %p114_p11  ;;  %s765_s5 = sand.u32 1, %s639_s14  }
  0x1d   : > { %p759_p3 = por %p121_p0, %p120_p13  ;;  %s378_s6 = sshll.u32 %s722_s22, 7 }
  0x1e   : > { %s377_s7 = sshll.u32 %s765_s5, 3  ;;  %s888_s0 = sld [smem:[#allocation11_spill]] }
  0x1f   : > { %s145_s19 = scalar_lea.vmem [#allocation2], %s377_s7  ;;  %p774_p5 = pnand %p408_p4, %p731_p6 }
  0x20   : > { %s155_s21 = sshll.u32 %s145_s19, 4  ;;  %p381_p7 = scmp.ge.s32.totalorder %s651_s17, 1  ;;  %s156_s21 = int_to_ptr.vmem [resolvable:$true] %s155_s21 }
  0x21   : > { %p181_p9 = scmp.lt.s32.totalorder %s651_s17, 3  ;;  %s142_s26 = scalar_lea.sflag [#allocation3], %s765_s5 }
  0x22   : > { %p489_p10 = pneg %p774_p5  ;;  %s500_s22 = scalar_lea.vmem %s156_s21, 128 }
  0x23   : > { %p501_p11 = scmp.ne.s32.totalorder %s156_s21, %s500_s22  ;;  %s653_s27 = smov [#allocation2]  }
  0x24   : > { %s153_s18 = scalar_lea.hbm %s888_s0, %s378_s6  ;;  %s505_s23 = sshll.u32 %s653_s27, 4  ;;  %s506_s23 = int_to_ptr.vmem [resolvable:$false] %s505_s23 }
  0x25   : > { %p503_p12 = pnand %p501_p11, %p489_p10  ;;  %s507_s28 = scalar_lea.vmem %s506_s23, 256 }
  0x26   : > { %p508_p6 = scmp.lt.s32.totalorder %s156_s21, %s506_s23  ;;  %p509_p0 = scmp.lt.s32.totalorder %s507_s28, %s500_s22 }
  0x27   : > { %p504_p13 = pneg %p503_p12 }
  0x28   : > { %p510_p4 = por %p509_p0, %p508_p6 }
  0x2a   : > { %p511_p2 = pnand %p510_p4, %p504_p13 }
  0x2c   : > { %514 = shalt.err (!%p511_p2)
}
  0x2d   : > { %400 = dma.hbm_to_vmem [thread:$0]  (!%p774_p5), %s153_s18, 128, %s156_s21, %s142_s26  }
  0x2e   : > { %p792_p11 = pnand %p381_p7, %p181_p9  ;;  %s174_s22 = scalar_lea.hbm %s881_s1, %s378_s6 }
  0x2f   : > { %s166_s27 = scalar_lea.vmem [#allocation5], %s377_s7  ;;  %s163_s28 = scalar_lea.sflag [#allocation6], %s765_s5 }
  0x30   : > { %s176_s23 = sshll.u32 %s166_s27, 4  ;;  %s654_s18 = smov [#allocation5]   ;;  %s177_s23 = int_to_ptr.vmem [resolvable:$true] %s176_s23 }
  0x31   : > { %s528_s0 = scalar_lea.vmem %s177_s23, 128  ;;  %s533_s21 = sshll.u32 %s654_s18, 4  ;;  %s534_s21 = int_to_ptr.vmem [resolvable:$false] %s533_s21 }
  0x32   : > { %p529_p2 = scmp.ne.s32.totalorder %s177_s23, %s528_s0  ;;  %s535_s26 = scalar_lea.vmem %s534_s21, 256 }
  0x33   : > { %p536_p7 = scmp.lt.s32.totalorder %s177_s23, %s534_s21  ;;  %p537_p9 = scmp.lt.s32.totalorder %s535_s26, %s528_s0 }
  0x34   : > { %p531_p12 = pnand %p529_p2, %p489_p10 }
  0x35   : > { %p538_p6 = por %p537_p9, %p536_p7 }
  0x36   : > { %p532_p13 = pneg %p531_p12 }
  0x38   : > { %p539_p0 = pnand %p538_p6, %p532_p13 }
  0x3a   : > { %542 = shalt.err (!%p539_p0)
}
  0x3b   : > { %403 = dma.hbm_to_vmem [thread:$0]  (!%p774_p5), %s174_s22, 128, %s177_s23, %s163_s28  }
  0x3c   : > { %185 = sbr.rel (%p792_p11) target bundleno = 105 (0x69), region = 28  ;;  %s187_s5 = sand.u32 (!%p792_p11), 1, %s635_s13  }
  0x3d   : > { %s382_s6 = sshll.u32 (!%p792_p11), %s187_s5, 3  ;;  %s188_s7 = scalar_lea.sflag (!%p792_p11), [#allocation3], %s187_s5 }
  0x3e   : > { %s191_s12 = scalar_lea.vmem (!%p792_p11), [#allocation2], %s382_s6 }
  0x41   : > { %606 = dma.done.wait (%p736_p8), %s188_s7, 128  }
  0x42   : > { %608 = vsyncadd (%p736_p8), %s188_s7, 4294967168  ;;  %s197_s0 = scalar_lea.sflag [#allocation6], %s187_s5  ;;  %s200_s19 = scalar_lea.vmem [#allocation5], %s382_s6 }
  0x43   : > { %610 = dma.done.wait (%p736_p8), %s197_s0, 128  }
  0x44   : > { %612 = vsyncadd (%p736_p8), %s197_s0, 4294967168  ;;  %v239_v0 = vld [vmem:[%s191_s12] sm:$0xff]  ;;  %s223_s24 = sand.u32 1, %s623_s10   ;;  %v240_v4 = vld [vmem:[%s200_s19] sm:$0xff]  ;;  %s390_s22 = sshll.u32 %s643_s15, 8 }
  0x45   : > { %v241_v1 = vmul.f32 0.5, %v239_v0  ;;  %s384_s8 = sshll.u32 %s223_s24, 4  ;;  %s821_s18 = scalar_lea.hbm %s882_s2, %s390_s22 }
  0x46   : > { %s225_s27 = scalar_lea.vmem [#allocation7], %s384_s8  ;;  %s825_s21 = scalar_lea.sflag [#allocation4], %s223_s24 }
  0x47   : > { %485 = vtanh.f32 %v241_v1  ;;  %s269_s23 = sshll.u32 %s225_s27, 4  ;;  %s655_s15 = smov [#allocation7]   ;;  %s823_s23 = int_to_ptr.vmem [resolvable:$true] %s269_s23 }
  0x48   : > { %s543_s26 = scalar_lea.vmem %s823_s23, 256  ;;  %s547_s5 = sshll.u32 %s655_s15, 4  ;;  %s548_s5 = int_to_ptr.vmem [resolvable:$false] %s547_s5 }
  0x49   : > { %p544_p8 = scmp.ne.s32.totalorder %s823_s23, %s543_s26  ;;  %s549_s6 = scalar_lea.vmem %s548_s5, 512 }
  0x4a   : > { %p550_p4 = scmp.lt.s32.totalorder %s823_s23, %s548_s5  ;;  %p551_p11 = scmp.lt.s32.totalorder %s549_s6, %s543_s26 }
  0x4b   : > { %p545_p5 = pnand %p544_p8, %p754_p1 }
  0x4c   : > { %p552_p2 = por %p551_p11, %p550_p4 }
  0x4d   : > { %p546_p10 = pneg %p545_p5 }
  0x4f   : > { %p553_p12 = pnand %p552_p2, %p546_p10 }
  0x54   : > { %v486_v2 = vpop.eup %485 }
  0x55   : > { %v243_v3 = vadd.f32 1.0, %v486_v2 }
  0x57   : > { %v244_v5 = vmul.f32 0.5, %v243_v3 }
  0x59   : > { %v245_v6 = vmul.f32 %v244_v5, %v240_v4  ;;  %v246_v7 = vadd.f32 %v244_v5, %v240_v4 }
  0x5b   : > { %250 = vst [vmem:[%s225_s27] sm:$0xff] %v245_v6  ;;  %254 = vst [vmem:[%s225_s27 + $0x8] sm:$0xff] %v246_v7 }
  0x5c   : > { %556 = shalt.err (!%p553_p12)
}
  0x5d   : > { %s557_s7 = scalar_lea.hbm %s821_s18, 256  ;;  %s561_s19 = scalar_lea.hbm %s882_s2, 512 }
  0x5e   : > { %p558_p13 = scmp.ne.s32.totalorder %s821_s18, %s557_s7  ;;  %p562_p6 = scmp.lt.s32.totalorder %s821_s18, %s882_s2 }
  0x5f   : > { %p563_p0 = scmp.lt.s32.totalorder %s561_s19, %s557_s7 }
  0x60   : > { %p559_p7 = pnand %p558_p13, %p754_p1 }
  0x61   : > { %p564_p8 = por %p563_p0, %p562_p6 }
  0x62   : > { %p560_p9 = pneg %p559_p7 }
  0x64   : > { %p565_p5 = pnand %p564_p8, %p560_p9 }
  0x66   : > { %568 = shalt.err (!%p565_p5)
}
  0x67   : > { %s656_s22 = smov 128   ;;  %s657_s27 = smov 8  }
  0x68   : > { %395 = dma.vmem_to_hbm [thread:$0]  (%p754_p1), %s823_s23, 256, %s821_s18, %s825_s21, %s656_s22, %s656_s22, %s657_s27  }
  0x69 PF: > { %s284_s28 = sand.u32 1, %s619_s9   ;;  %p891_p10 = scmp.ge.s32.totalorder %s651_s17, 2 }
  0x6a   : > { %s285_s25 = scalar_lea.sflag [#allocation4], %s284_s28 }
  0x6b   : > { %p405_p4 = pnand %p891_p10, %p759_p3 }
  0x6d   : > { %p406_p11 = pneg %p405_p4 }
  0x6f   : > { %614 = dma.done.wait (%p406_p11), %s285_s25, 256  }
  0x70   : > { %616 = vsyncadd (%p406_p11), %s285_s25, 4294967040  ;;  %s21_s17 = sadd.s32 1, %s651_s17   ;;  %s892_s9 = smov %s623_s10 }
  0x71   : > { %p18_p2 = scmp.ge.s32.totalorder %s21_s17, 4   ;;  %s893_s10 = smov %s627_s11 }
  0x72   : > { %s894_s11 = smov %s745_s29  ;;  %s895_s12 = smov %s635_s13 }
  0x73   : > { %s896_s13 = smov %s639_s14  ;;  %s897_s14 = smov %s748_s30 }
  0x74   : > { %s898_s15 = smov %s647_s16  ;;  %s899_s16 = smov %s901_s20 }
  0x75   :  { %20 = sbr.rel (!%p18_p2) target bundleno = 12 (0xc), region = 90 }
  0x7a   :  { %290 = vsyncpa [#allocation3], 1 }
  0x7b   :  { %292 = vsyncpa [#allocation3 + $0x1], 1 }
  0x7c   :  { %293 = vsyncpa [#allocation6], 1 }
  0x7d   :  { %295 = vsyncpa [#allocation6 + $0x1], 1 }
  0x7e   :  { %296 = vsyncpa [#allocation4], 1 }
  0x7f   :  { %298 = vsyncpa [#allocation4 + $0x1], 1 }

</bundles_post_ra>
